<compile_context>
chip_gen: v6e
topology: v6e:2x2x1
jax: 0.10.0
libtpu: 0.0.40
codegen_flags: <defaults>
</compile_context>

<pallas_src>
import jax
import jax.numpy as jnp
from jax.experimental import pallas as pl
from jax.experimental.pallas import tpu as pltpu


_TARGET_TILE_BYTES = 8 * 1024 * 1024   # ~8 MiB per tile (4x buffering = 32 MiB)
_MIN_GRID_FOR_MEGACORE = 4             # keep >=4 tiles so v7x dual-TC balances
_VMEM_LIMIT_BYTES = 40 * 1024 * 1024   # < v7x's 64 MiB/TC physical VMEM


def _round_up(x: int, m: int) -> int:
    return (x + m - 1) // m * m


def _scale_kernel(factor_ref, x_ref, o_ref):
    # One free SMEM scalar load per tile; multiply in the tensor's own dtype.
    f = factor_ref[0].astype(o_ref.dtype)
    o_ref[...] = f * x_ref[...]


def _scale_2d(x2d: jax.Array, factor_arr: jax.Array, tm: int, cols: int) -> jax.Array:
    rows = x2d.shape[0]
    itemsize = jnp.dtype(x2d.dtype).itemsize
    nbytes = rows * cols * itemsize
    return pl.pallas_call(
        _scale_kernel,
        out_shape=jax.ShapeDtypeStruct((rows, cols), x2d.dtype),
        grid=(pl.cdiv(rows, tm),),
        in_specs=[
            pl.BlockSpec(memory_space=pltpu.MemorySpace.SMEM),   # factor scalar
            pl.BlockSpec((tm, cols), lambda i: (i, 0)),
        ],
        out_specs=pl.BlockSpec((tm, cols), lambda i: (i, 0)),
        compiler_params=pltpu.CompilerParams(
            # "parallel" lets v7x shard the 1-D grid across its 2 TensorCores
            # (harmless no-op on single-TC v5e/v6e).
            dimension_semantics=("parallel",),
            vmem_limit_bytes=_VMEM_LIMIT_BYTES,
        ),
        cost_estimate=pl.CostEstimate(
            flops=rows * cols, transcendentals=0, bytes_accessed=2 * nbytes
        ),
    )(factor_arr, x2d)


def _scaling_impl(x: jax.Array, factor) -> jax.Array:
    orig_shape = x.shape
    dtype = x.dtype
    n = x.size
    if n == 0:
        return x

    itemsize = jnp.dtype(dtype).itemsize
    # Minimal sublane multiple so sub-32-bit dtypes keep unmasked full tiles.
    packing = max(8, 32 // itemsize)

    factor_arr = jnp.asarray(factor, jnp.float32).reshape((1,))

    # Lane-dense columns that divide n -> zero-copy reshape (no padding).
    cols = None
    for c in (512, 256, 128):
        if n % c == 0:
            cols = c
            break

    if cols is not None:
        rows = n // cols
        x2d = x.reshape(rows, cols)
        pad_tail = 0
    else:
        # Rare fallback for sizes not divisible by 128: tiny tail pad only.
        cols = 128
        rows = pl.cdiv(n, cols)
        pad_tail = rows * cols - n
        x2d = jnp.pad(x.reshape(-1), (0, pad_tail)).reshape(rows, cols)

    # Rows per tile: target ~8 MiB, cap so the grid has >=4 tiles when the
    # tensor is big enough, round to the dtype's sublane packing.
    tm_cap = max(packing, (_TARGET_TILE_BYTES // (cols * itemsize)) // packing * packing)
    tm = min(tm_cap, _round_up(pl.cdiv(rows, _MIN_GRID_FOR_MEGACORE), packing))
    tm = max(tm, packing)

    out2d = _scale_2d(x2d, factor_arr, tm, cols)

    if pad_tail:
        return out2d.reshape(-1)[:n].reshape(orig_shape)
    return out2d.reshape(orig_shape)


# jit: compiles the (cheap) reshape plumbing + kernel once per shape/dtype and
# lets `factor` be a traced runtime value (no recompile per factor).
scaling = jax.jit(_scaling_impl)


if __name__ == "__main__":
    key = jax.random.PRNGKey(0)
    # Shapes consistent with a typical NCHW conv input: batch=2, C=4, H=W=16
    x = jax.random.normal(key, (2, 4, 16, 16), dtype=jnp.float32)
    factor = 2.5

    y = scaling(x, factor)
    jax.block_until_ready(y)

    assert y.shape == x.shape and y.dtype == x.dtype
    assert jnp.allclose(y, factor * x, atol=1e-6, rtol=1e-6)

    # Exercise the non-128-divisible fallback path once as well.
    x_odd = jax.random.normal(jax.random.PRNGKey(1), (3, 5, 7), dtype=jnp.float32)
    y_odd = scaling(x_odd, factor)
    jax.block_until_ready(y_odd)
    assert y_odd.shape == x_odd.shape
    assert jnp.allclose(y_odd, factor * x_odd, atol=1e-6, rtol=1e-6)

    print("KERNEL_OK")
</pallas_src>

<mosaic_0001>
module attributes {stable_mosaic.version = 11 : i64} {
  func.func @_scale_kernel(%arg0: i32, %arg1: memref<1xf32, #tpu.memory_space<smem>>, %arg2: memref<8x512xf32, #tpu.memory_space<vmem>>, %arg3: memref<8x512xf32, #tpu.memory_space<vmem>>) attributes {dimension_semantics = [#tpu.dimension_semantics<parallel>], iteration_bounds = array<i64: 1>, scalar_prefetch = 0 : i64, scratch_operands = 0 : i64, tpu.core_type = #tpu.core_type<tc>, window_params = [{transform_indices = @transform_0, window_bounds = array<i64: 1>}, {transform_indices = @transform_1, window_bounds = array<i64: 8, 512>}, {transform_indices = @transform_2, window_bounds = array<i64: 8, 512>}]} {
    %c0 = arith.constant 0 : index
    %0 = memref.load %arg1[%c0] : memref<1xf32, #tpu.memory_space<smem>>
    %c0_0 = arith.constant 0 : index
    %c0_1 = arith.constant 0 : index
    %1 = vector.load %arg2[%c0_0, %c0_1] : memref<8x512xf32, #tpu.memory_space<vmem>>, vector<8x512xf32>
    %2 = vector.broadcast %0 : f32 to vector<8x512xf32>
    %3 = arith.mulf %2, %1 : vector<8x512xf32>
    %c0_2 = arith.constant 0 : index
    %c0_3 = arith.constant 0 : index
    %4 = vector.load %arg3[%c0_2, %c0_3] : memref<8x512xf32, #tpu.memory_space<vmem>>, vector<8x512xf32>
    tpu.vector_store %arg3[%c0_2, %c0_3], %3 {strides = array<i32>} : memref<8x512xf32, #tpu.memory_space<vmem>>, vector<8x512xf32>,
    return
  }
  func.func @transform_0(%arg0: i32) -> i32 {
    %c0_i32 = arith.constant 0 : i32
    %c0_i32_0 = arith.constant 0 : i32
    return %c0_i32 : i32
  }
  func.func @transform_1(%arg0: i32) -> (i32, i32) {
    %c0_i32 = arith.constant 0 : i32
    %c0_i32_0 = arith.constant 0 : i32
    return %arg0, %c0_i32 : i32, i32
  }
  func.func @transform_2(%arg0: i32) -> (i32, i32) {
    %c0_i32 = arith.constant 0 : i32
    %c0_i32_0 = arith.constant 0 : i32
    return %arg0, %c0_i32 : i32, i32
  }
}

</mosaic_0001>

<bundles_post_ra>
// kernel: _scaling_impl.1
= control target key start
LH: loop header
LB: loop body
LE: loop exit
PB: predicated region body
PF: predicated region fallthrough
CT: control target
= control target key end

     0   :  { %s83_s0 = inlined_call_operand.<no memory space> [shape: f32[1], index: 0, kind: input, shape index: {}]   ;;  %s84_s1 = inlined_call_operand.vmem [shape: f32[4,512], index: 1, kind: input, shape index: {}]   ;;  %s85_s2 = inlined_call_operand.vmem [shape: f32[4,512], index: 2, kind: output, shape index: {}]  }
   0x1   :  { %v13_v0 = vld [vmem:[%s84_s1] sm:$0xff]  ;;  %v17_v1 = vstv %s83_s0  ;;  %v14_v2 = vld [vmem:[%s84_s1 + $0x8] sm:$0xff] }
   0x2   :  { %v18_v3 = vmul.f32 %v17_v1, %v13_v0  ;;  %v19_v4 = vmul.f32 %v17_v1, %v14_v2 }
   0x4   :  { %41 = vst [vmem:[%s85_s2] sm:$0xff] %v18_v3  ;;  %43 = vst [vmem:[%s85_s2 + $0x8] sm:$0xff] %v19_v4 }

</bundles_post_ra>
